<compile_context>
chip_gen: v7x
topology: tpu7x:2x2x1
jax: 0.10.0
libtpu: 0.0.40
codegen_flags: <defaults>
</compile_context>

<pallas_src>
from functools import partial

import numpy as np
import jax
import jax.numpy as jnp
from jax.experimental import pallas as pl
from jax.experimental.pallas import tpu as pltpu


def _round_up(x, m):
    return ((x + m - 1) // m) * m


# ----------------------------- Pallas kernel --------------------------------
def _sam2_decode_kernel(coef_ref, coord_ref, img_ref, out_ref):
    """Prompt-conditioned mask decode for one (TD frames, THW pixels) tile.

    coef_ref  : (TD, 4)   f32  per-frame decode coefficients
                           [c_img/255, c_row, c_col, bias + c_img*128/255]
    coord_ref : (2, THW)  f32  normalized (row, col) coordinate maps
    img_ref   : (TD, THW) int8 pixel value - 128 (offset folded into bias)
    out_ref   : (TD, THW) int8 binary mask {0, 1}
    """
    coef = coef_ref[...]                      # (TD, 4)
    c_img = coef[:, 0:1]                      # (TD, 1)
    c_row = coef[:, 1:2]
    c_col = coef[:, 2:3]
    bias = coef[:, 3:4]

    hh = coord_ref[0:1, :]                    # (1, THW)
    ww = coord_ref[1:2, :]

    img = img_ref[...].astype(jnp.float32)    # (TD, THW)
    logits = c_img * img + c_row * hh + c_col * ww + bias

    # (mask_logits > 0.0) exactly as in the PyTorch wrapper.
    out_ref[...] = jnp.where(logits > 0.0, 1.0, 0.0).astype(out_ref.dtype)


# ----------------------------- tiling helpers --------------------------------
def _frame_tiling(d):
    """(Dp, TD): int8 sublane tile is 32, so frame blocks are either the full
    (8-rounded) extent (always legal, avoids over-padding tiny D) or 32."""
    if d <= 64:
        dp = _round_up(d, 8)
        return dp, dp
    dp = _round_up(d, 32)
    return dp, 32


def _lane_tiling(hw, cap=32768):
    """(HWp, THW): pad pixels to a multiple of 128 (lane-dense, unmasked
    stores) and pick a lane tile <= cap with negligible padding waste."""
    hw128 = _round_up(hw, 128)
    if hw128 <= cap:
        return hw128, hw128
    n_tiles = -(-hw128 // cap)
    thw = _round_up(-(-hw128 // n_tiles), 128)
    return thw * n_tiles, thw


def sam2_mask_kernel(img_q, coef, coord, *, frames_per_block, lane_tile):
    """img_q: (Dp, HWp) int8. Returns (Dp, HWp) int8 mask in {0, 1}."""
    Dp, HWp = img_q.shape
    TD, THW = frames_per_block, lane_tile
    assert Dp % TD == 0 and HWp % THW == 0
    # Pixel tiles OUTER, frame blocks INNER: coord's block index is constant
    # across inner steps, so its re-fetch is elided by the pipeline.
    grid = (HWp // THW, Dp // TD)
    return pl.pallas_call(
        _sam2_decode_kernel,
        out_shape=jax.ShapeDtypeStruct((Dp, HWp), jnp.int8),
        grid_spec=pltpu.PrefetchScalarGridSpec(
            num_scalar_prefetch=0,
            grid=grid,
            in_specs=[
                # tiny per-frame coefficient table
                pl.BlockSpec((TD, 4), lambda h, g: (g, 0)),
                # frame-invariant coordinate maps (reused across frame blocks)
                pl.BlockSpec((2, THW), lambda h, g: (0, h)),
                # int8 image: frames on sublanes x lane-dense pixel tile
                pl.BlockSpec((TD, THW), lambda h, g: (g, h)),
            ],
            out_specs=pl.BlockSpec((TD, THW), lambda h, g: (g, h)),
        ),
        compiler_params=pltpu.CompilerParams(
            dimension_semantics=("parallel", "parallel"),
            vmem_limit_bytes=32 * 1024 * 1024,   # explicit; safe on v5e/v6e/v7x
        ),
    )(coef, coord, img_q)


# ------------------------------- glue ----------------------------------------
def parse_guidance(guidance, H, W, max_points=8):
    """Mirrors the point parsing of SAM2Network.run_3d."""
    rows = []
    for key, label in (("lesion", 1), ("background", 0)):
        point_tensor = np.asarray(guidance[key])
        if point_tensor.size == 0:
            continue
        for point_id in range(point_tensor.shape[1]):
            p = point_tensor[:, point_id, :][0][1:]   # [c0, c1, slice_id]
            c0, c1, sid = float(p[0]), float(p[1]), float(p[2])
            x, y = c1, c0                              # original swaps to [p[1], p[0]]
            sign = 1.0 if label == 1 else -1.0
            rows.append([x / max(W - 1, 1), y / max(H - 1, 1), sign, 1.0, sid])
    while len(rows) < max_points:
        rows.append([0.0, 0.0, 0.0, 0.0, -1.0e6])      # zero-weight padding point
    return jnp.asarray(rows[:max_points], dtype=jnp.float32)


@partial(jax.jit, static_argnames=("tau",))
def _sam2_core(image, pts, wenc_t, wprompt, bias, *, tau=4.0):
    H, W, D = image.shape
    HW = H * W
    Dp, TD = _frame_tiling(D)
    HWp, THW = _lane_tiling(HW)

    # Frame-invariant prompt math + per-frame decode coefficients, hoisted out
    # of the kernel (replaces the in-kernel exp + cross-lane reductions).
    pemb = jnp.dot(pts[:, 0:4], wprompt)                 # (P, C)
    pev = jnp.dot(pemb, wenc_t) * pts[:, 2:3]            # (P, 3), sign folded
    sid = pts[:, 4]                                      # (P,)
    d = jnp.arange(Dp, dtype=jnp.float32)                # (Dp,)
    # Per-prompt relevance per frame (stand-in for SAM2 memory attention).
    rel = jnp.exp(-((sid[None, :] - d[:, None]) ** 2) * (1.0 / tau))   # (Dp, P)
    c = jnp.dot(rel, pev)                                # (Dp, 3)
    b0 = jnp.asarray(bias, dtype=jnp.float32).reshape(-1)[0]
    # Fold the 1/255 normalization and the int8 "-128" offset into the coeffs
    # so the kernel reads raw int8 pixels.
    coef = jnp.stack(
        [c[:, 0] * (1.0 / 255.0),
         c[:, 1],
         c[:, 2],
         b0 + c[:, 0] * (128.0 / 255.0)],
        axis=1).astype(jnp.float32)                      # (Dp, 4)

    # Frame-invariant normalized coordinate maps (integer iota -> no drift).
    idx = jnp.arange(HWp, dtype=jnp.int32)
    hh = (idx // W).astype(jnp.float32) * (1.0 / float(max(H - 1, 1)))
    ww = (idx % W).astype(jnp.float32) * (1.0 / float(max(W - 1, 1)))
    coord = jnp.stack([hh, ww], axis=0)                  # (2, HWp)

    # (H, W, D) f32 in [0,255] -> (Dp, HWp) int8 (value - 128); one fused pass.
    img_q = jnp.transpose(image, (2, 0, 1)).reshape(D, HW)
    img_q = jnp.clip(jnp.round(img_q - 128.0), -128.0, 127.0).astype(jnp.int8)
    img_q = jnp.pad(img_q, ((0, Dp - D), (0, HWp - HW)))

    mask = sam2_mask_kernel(img_q, coef, coord,
                            frames_per_block=TD, lane_tile=THW)   # (Dp, HWp) int8

    # The kernel already emits the final {0,1} mask; the wrapper's
    # forward/backward logical OR is a no-op here since both passes would
    # reuse the same per-frame decode.
    # TODO(synk): SAM2 memory-bank video propagation (propagate_in_video
    # forward/reverse over the learned predictor state) has no clean Pallas
    # equivalent.
    pred = mask[:D, :HW].reshape(D, H, W)
    pred_hwd = jnp.transpose(pred, (1, 2, 0)).astype(jnp.float32)  # (H, W, D)
    return pred_hwd[None, None]                                     # (1,1,H,W,D)


def sam2_forward(x, wenc_t, wprompt, bias, *, tau=4.0):
    """Reproduces SAM2Network.forward contract: dict in -> (1, 1, H, W, D) out."""
    image = jnp.squeeze(x["image"])[0]        # (H, W, D), like torch.squeeze(...)[0]
    H, W, _ = image.shape
    pts = parse_guidance(x["guidance"], H, W)
    return _sam2_core(image, pts, wenc_t, wprompt, bias, tau=tau)


# ------------------------------- main ----------------------------------------
if __name__ == "__main__":
    H = W = 16
    D = 16
    C = 32

    key = jax.random.PRNGKey(0)
    k_img, k_enc, k_prompt = jax.random.split(key, 3)

    # Input dict mirroring the PyTorch module's forward() contract.
    image = jax.random.uniform(k_img, (1, 3, H, W, D), dtype=jnp.float32) * 255.0
    guidance = {
        "lesion": np.array([[[0, 5, 7, 3], [0, 10, 12, 5], [0, 8, 4, 11]]],
                           dtype=np.int64),
        "background": np.array([[[0, 2, 2, 8]]], dtype=np.int64),
    }
    x = {"image": image, "guidance": guidance,
         "case_name": "case_000", "reset_state": True}

    # Deterministic synthetic parameters (no checkpoint load).
    wenc_t = 0.5 * jax.random.normal(k_enc, (C, 3), dtype=jnp.float32)
    wprompt = 0.5 * jax.random.normal(k_prompt, (4, C), dtype=jnp.float32)
    bias = jnp.zeros((1,), dtype=jnp.float32)

    out = sam2_forward(x, wenc_t, wprompt, bias)
    out = jax.block_until_ready(out)
    assert out.shape == (1, 1, H, W, D), out.shape
    assert out.dtype == jnp.float32
    print("KERNEL_OK")
</pallas_src>

<mosaic_0001>
module attributes {stable_mosaic.version = 11 : i64} {
  func.func @_sam2_decode_kernel(%arg0: i32, %arg1: i32, %arg2: memref<16x4xf32, #tpu.memory_space<vmem>>, %arg3: memref<2x256xf32, #tpu.memory_space<vmem>>, %arg4: memref<16x256xi8, #tpu.memory_space<vmem>>, %arg5: memref<16x256xi8, #tpu.memory_space<vmem>>) attributes {dimension_semantics = [#tpu.dimension_semantics<parallel>, #tpu.dimension_semantics<parallel>], iteration_bounds = array<i64: 1, 1>, scalar_prefetch = 0 : i64, scratch_operands = 0 : i64, tpu.core_type = #tpu.core_type<tc>, window_params = [{transform_indices = @transform_0, window_bounds = array<i64: 16, 4>}, {transform_indices = @transform_1, window_bounds = array<i64: 2, 256>}, {transform_indices = @transform_2, window_bounds = array<i64: 16, 256>}, {transform_indices = @transform_3, window_bounds = array<i64: 16, 256>}]} {
    %c0 = arith.constant 0 : index
    %c0_0 = arith.constant 0 : index
    %0 = vector.load %arg2[%c0, %c0_0] : memref<16x4xf32, #tpu.memory_space<vmem>>, vector<16x4xf32>
    %1 = vector.extract_strided_slice %0 {offsets = [0, 0], sizes = [16, 1], strides = [1, 1]} : vector<16x4xf32> to vector<16x1xf32>
    %2 = vector.extract_strided_slice %0 {offsets = [0, 1], sizes = [16, 1], strides = [1, 1]} : vector<16x4xf32> to vector<16x1xf32>
    %3 = vector.extract_strided_slice %0 {offsets = [0, 2], sizes = [16, 1], strides = [1, 1]} : vector<16x4xf32> to vector<16x1xf32>
    %4 = vector.extract_strided_slice %0 {offsets = [0, 3], sizes = [16, 1], strides = [1, 1]} : vector<16x4xf32> to vector<16x1xf32>
    %c0_1 = arith.constant 0 : index
    %c0_2 = arith.constant 0 : index
    %5 = vector.load %arg3[%c0_1, %c0_2] : memref<2x256xf32, #tpu.memory_space<vmem>>, vector<1x256xf32>
    %c1 = arith.constant 1 : index
    %c0_3 = arith.constant 0 : index
    %6 = vector.load %arg3[%c1, %c0_3] : memref<2x256xf32, #tpu.memory_space<vmem>>, vector<1x256xf32>
    %c0_4 = arith.constant 0 : index
    %c0_5 = arith.constant 0 : index
    %7 = vector.load %arg4[%c0_4, %c0_5] : memref<16x256xi8, #tpu.memory_space<vmem>>, vector<16x256xi8>
    %8 = arith.sitofp %7 : vector<16x256xi8> to vector<16x256xf32>
    %9 = vector.broadcast %1 : vector<16x1xf32> to vector<16x256xf32>
    %10 = arith.mulf %9, %8 : vector<16x256xf32>
    %11 = vector.broadcast %2 : vector<16x1xf32> to vector<16x256xf32>
    %12 = vector.broadcast %5 : vector<1x256xf32> to vector<16x256xf32>
    %13 = arith.mulf %11, %12 : vector<16x256xf32>
    %14 = arith.addf %10, %13 : vector<16x256xf32>
    %15 = vector.broadcast %3 : vector<16x1xf32> to vector<16x256xf32>
    %16 = vector.broadcast %6 : vector<1x256xf32> to vector<16x256xf32>
    %17 = arith.mulf %15, %16 : vector<16x256xf32>
    %18 = arith.addf %14, %17 : vector<16x256xf32>
    %19 = vector.broadcast %4 : vector<16x1xf32> to vector<16x256xf32>
    %20 = arith.addf %18, %19 : vector<16x256xf32>
    %cst = arith.constant 0.000000e+00 : f32
    %21 = vector.broadcast %cst : f32 to vector<16x256xf32>
    %22 = arith.cmpf ogt, %20, %21 : vector<16x256xf32>
    %cst_6 = arith.constant 1.000000e+00 : f32
    %cst_7 = arith.constant 0.000000e+00 : f32
    %23 = vector.broadcast %cst_6 : f32 to vector<16x256xf32>
    %24 = vector.broadcast %cst_7 : f32 to vector<16x256xf32>
    %25 = arith.select %22, %23, %24 : vector<16x256xi1>, vector<16x256xf32>
    %26 = arith.fptosi %25 : vector<16x256xf32> to vector<16x256xi8>
    %c0_8 = arith.constant 0 : index
    %c0_9 = arith.constant 0 : index
    %27 = vector.load %arg5[%c0_8, %c0_9] : memref<16x256xi8, #tpu.memory_space<vmem>>, vector<16x256xi8>
    tpu.vector_store %arg5[%c0_8, %c0_9], %26 {strides = array<i32>} : memref<16x256xi8, #tpu.memory_space<vmem>>, vector<16x256xi8>,
    return
  }
  func.func @transform_0(%arg0: i32, %arg1: i32) -> (i32, i32) {
    %c0_i32 = arith.constant 0 : i32
    %c0_i32_0 = arith.constant 0 : i32
    return %arg1, %c0_i32 : i32, i32
  }
  func.func @transform_1(%arg0: i32, %arg1: i32) -> (i32, i32) {
    %c0_i32 = arith.constant 0 : i32
    %c0_i32_0 = arith.constant 0 : i32
    return %c0_i32, %arg0 : i32, i32
  }
  func.func @transform_2(%arg0: i32, %arg1: i32) -> (i32, i32) {
    %c0_i32 = arith.constant 0 : i32
    return %arg1, %arg0 : i32, i32
  }
  func.func @transform_3(%arg0: i32, %arg1: i32) -> (i32, i32) {
    %c0_i32 = arith.constant 0 : i32
    return %arg1, %arg0 : i32, i32
  }
}

</mosaic_0001>

<bundles_post_ra>
// kernel: _sam2_core.1
= control target key start
LH: loop header
LB: loop body
LE: loop exit
PB: predicated region body
PF: predicated region fallthrough
CT: control target
= control target key end

     0   :  { %v165_v0 = vmov 1   ;;  %v166_v1 = vmov 0   ;;  %v167_v4 = vmov 2   ;;  %v168_v5 = vmov 3   ;;  %s211_s0 = inlined_call_operand.vmem [shape: f32[16,4], index: 0, kind: input, shape index: {}]   ;;  %s212_s2 = inlined_call_operand.vmem [shape: s8[16,256], index: 2, kind: input, shape index: {}]   ;;  %s213_s1 = inlined_call_operand.vmem [shape: f32[2,256], index: 1, kind: input, shape index: {}]   ;;  %s214_s3 = inlined_call_operand.vmem [shape: s8[16,256], index: 3, kind: output, shape index: {}]  }
   0x1   :  { %160 = vset.pattern.permute.xlu1 %v165_v0  ;;  %159 = vset.pattern.permute.xlu0 %v166_v1  ;;  %v14_v2 = vld [vmem:[%s211_s0] sm:$0xff]  ;;  %v15_v3 = vld [vmem:[%s211_s0 + $0x8] sm:$0xff]  ;;  %v52_v6 = vlaneseq  ;;  %v169_v57 = vmov 0.0  }
   0x2   :  { %44 = vperm.xlu1 %160, %v14_v2   ;;  %31 = vperm.xlu0 %159, %v14_v2   ;;  %v149_v8 = vld [vmem:[%s212_s2] sm:$0xff]  }
   0x3   :  { %v53_v7 = vshrl.u32 %v52_v6, 7  ;;  %v150_v11 = vunpack.c.0.s8 %v149_v8  ;;  %v151_v12 = vunpack.c.1.s8 %v149_v8  ;;  %v16_v13 = vld [vmem:[%s213_s1] ss:$2 sm:$0x3]  ;;  %v152_v14 = vunpack.c.2.s8 %v149_v8 }
   0x4   :  { %v153_v15 = vunpack.c.3.s8 %v149_v8  ;;  %v147_v24 = vld [vmem:[%s213_s1 + $0x1] ss:$2 sm:$0x3] }
   0x5   :  { %v54_v9 = vsub.s32 0, %v53_v7  ;;  %v58_v10 = vsub.s32 1, %v53_v7  ;;  %v25_v19 = vcvt.s32.f32 %v150_v11  ;;  %v26_v20 = vcvt.s32.f32 %v151_v12 }
   0x6   :  { %48 = vperm.xlu1 %160, %v15_v3   ;;  %36 = vperm.xlu0 %159, %v15_v3   ;;  %v27_v22 = vcvt.s32.f32 %v152_v14  ;;  %v28_v23 = vcvt.s32.f32 %v153_v15 }
   0x7   :  { %v55_v16 = vrot.slane %v16_v13, %v54_v9  ;;  %v59_v17 = vrot.slane %v16_v13, %v58_v10  ;;  %v82_v35 = vrot.slane %v147_v24, %v54_v9  ;;  %v86_v36 = vrot.slane %v147_v24, %v58_v10 }
   0xa   :  { %162 = vset.pattern.permute.xlu1 %v167_v4  ;;  %161 = vset.pattern.permute.xlu0 %v167_v4 }
   0xb   :  { %75 = vperm.xlu1 %162, %v15_v3   ;;  %71 = vperm.xlu0 %161, %v14_v2  }
   0xf   :  { %163 = vset.pattern.permute.xlu1 %v168_v5  ;;  %164 = vset.pattern.permute.xlu0 %v168_v5 }
  0x10   :  { %98 = vperm.xlu1 %163, %v14_v2   ;;  %102 = vperm.xlu0 %164, %v15_v3  }
  0x81   :  { %v45_v18 = vpop.permute.xlu1 %44  ;;  %v32_v21 = vpop.permute.xlu0 %31 }
  0x82   :  { %v62_v25 = vmul.f32 %v55_v16, %v45_v18  ;;  %v63_v26 = vmul.f32 %v59_v17, %v45_v18  ;;  %v39_v27 = vmul.f32 %v32_v21, %v25_v19  ;;  %v40_v28 = vmul.f32 %v32_v21, %v26_v20 }
  0x84   :  { %v66_v37 = vadd.f32 %v62_v25, %v39_v27  ;;  %v67_v38 = vadd.f32 %v63_v26, %v40_v28 }
  0x85   :  { %v49_v29 = vpop.permute.xlu1 %48  ;;  %v37_v30 = vpop.permute.xlu0 %36 }
  0x86   :  { %v64_v31 = vmul.f32 %v55_v16, %v49_v29  ;;  %v65_v32 = vmul.f32 %v59_v17, %v49_v29  ;;  %v41_v33 = vmul.f32 %v37_v30, %v27_v22  ;;  %v42_v34 = vmul.f32 %v37_v30, %v28_v23 }
  0x88   :  { %v68_v39 = vadd.f32 %v64_v31, %v41_v33  ;;  %v69_v40 = vadd.f32 %v65_v32, %v42_v34 }
  0x8a   :  { %v76_v41 = vpop.permute.xlu1 %75  ;;  %v72_v42 = vpop.permute.xlu0 %71 }
  0x8b   :  { %v91_v43 = vmul.f32 %v82_v35, %v76_v41  ;;  %v92_v44 = vmul.f32 %v86_v36, %v76_v41  ;;  %v89_v45 = vmul.f32 %v82_v35, %v72_v42  ;;  %v90_v46 = vmul.f32 %v86_v36, %v72_v42 }
  0x8d   :  { %v93_v47 = vadd.f32 %v89_v45, %v66_v37  ;;  %v94_v48 = vadd.f32 %v90_v46, %v67_v38  ;;  %v95_v49 = vadd.f32 %v91_v43, %v68_v39  ;;  %v96_v50 = vadd.f32 %v92_v44, %v69_v40 }
  0x8f   :  { %v99_v51 = vpop.permute.xlu1 %98  ;;  %v103_v52 = vpop.permute.xlu0 %102 }
  0x90   :  { %v105_v53 = vadd.f32 %v99_v51, %v93_v47  ;;  %v106_v54 = vadd.f32 %v99_v51, %v94_v48  ;;  %v107_v55 = vadd.f32 %v103_v52, %v95_v49  ;;  %v108_v56 = vadd.f32 %v103_v52, %v96_v50 }
  0x92   :  { %vm109_vm0 = vcmp.gt.f32.partialorder %v105_v53, 0.0  ;;  %vm110_vm1 = vcmp.gt.f32.partialorder %v106_v54, 0.0  ;;  %vm111_vm2 = vcmp.gt.f32.partialorder %v107_v55, 0.0  ;;  %vm112_vm3 = vcmp.gt.f32.partialorder %v108_v56, 0.0 }
  0x93   :  { %v113_v58 = vsel %vm109_vm0, 1.0, %v169_v57  ;;  %v114_v59 = vsel %vm110_vm1, 1.0, %v169_v57  ;;  %v115_v60 = vsel %vm111_vm2, 1.0, %v169_v57  ;;  %v116_v61 = vsel %vm112_vm3, 1.0, %v169_v57 }
  0x94   :  { %v117_v62 = vtrunc.f32 %v113_v58  ;;  %v118_v63 = vtrunc.f32 %v114_v59  ;;  %v119_v0 = vtrunc.f32 %v115_v60  ;;  %v120_v1 = vtrunc.f32 %v116_v61 }
  0x96   :  { %v121_v2 = vpack.c.f32.eXmY %v117_v62, %v119_v0, 312  ;;  %v127_v3 = vpack.c.f32.eXmY %v118_v63, %v120_v1, 312 }
  0x98   :  { %v125_v4 = vpack.c.b8 %v121_v2, %v121_v2  ;;  %v131_v5 = vpack.c.b8 %v127_v3, %v127_v3 }
  0x9a   :  { %v133_v6 = vunpack.c.0.s8 %v125_v4  ;;  %v134_v7 = vunpack.c.0.s8 %v131_v5  ;;  %v135_v8 = vunpack.c.1.s8 %v125_v4  ;;  %v136_v9 = vunpack.c.1.s8 %v131_v5 }
  0x9c   :  { %v137_v10 = vpack.c.b16 %v134_v7, %v133_v6  ;;  %v139_v11 = vpack.c.b16 %v136_v9, %v135_v8 }
  0x9e   :  { %v138_v12 = vpack.c.b8 %v137_v10, %v137_v10  ;;  %v140_v13 = vpack.c.b8 %v139_v11, %v139_v11 }
  0xa0   :  { %141 = vst [vmem:[%s214_s3] sm:$0xf] %v138_v12  ;;  %142 = vst [vmem:[%s214_s3 + $0x4] sm:$0xf] %v140_v13 }

</bundles_post_ra>
